<compile_context>
chip_gen: v5e
topology: v5e:2x2
jax: 0.10.0
libtpu: 0.0.40
codegen_flags: <defaults>
</compile_context>

<pallas_src>
import functools

import jax
import jax.numpy as jnp
from jax.experimental import pallas as pl
from jax.experimental.pallas import tpu as pltpu

LANE = 128              # lane width: hidden dims padded to multiples of this
MAX_BATCH_BLOCK = 1024  # rows per grid step for large batches


def _round_up(n, m):
    return ((n + m - 1) // m) * m


# ----------------------------------------------------------------------------
# Fused MLP kernel: entire network in one body, activations never leave vregs.
# ----------------------------------------------------------------------------
def _fused_mlp_kernel(*refs, n_layers, final_softmax):
    """refs = (x_ref, w0, b0, w1, b1, ..., w_{L-1}, b_{L-1}, o_ref)

      x_ref : [TB, D0]        bf16   (feature dim unpadded)
      w_i   : [Kin_p, Kout_p] bf16   (hidden dims lane-padded; last out dim
                                      unpadded = task_dim; pads are zero)
      b_i   : [1, Kout_p]     f32
      o_ref : [TB, task_dim]  f32
    """
    x_ref = refs[0]
    o_ref = refs[-1]
    h = x_ref[...]                                   # bf16 activations
    for i in range(n_layers):
        w_ref = refs[1 + 2 * i]
        b_ref = refs[2 + 2 * i]
        # bf16 operands on the MXU, f32 accumulation, f32 epilogue.
        y = jnp.dot(h, w_ref[...], preferred_element_type=jnp.float32) + b_ref[...]
        if i < n_layers - 1:
            # ReLU on the VPU, carry the hidden activation as bf16.
            h = jnp.maximum(y, 0.0).astype(jnp.bfloat16)
        else:
            h = y                                    # f32 logits, width == task_dim
    if final_softmax:
        m = jnp.max(h, axis=1, keepdims=True)
        e = jnp.exp(h - m)                           # EUP
        s = jnp.sum(e, axis=1, keepdims=True)        # XLU reduce
        h = e * pl.reciprocal(s, approx=False)       # exact normalization
    o_ref[...] = h.astype(o_ref.dtype)


@functools.partial(jax.jit, static_argnames=("final_softmax",))
def _task_decoder_forward(x, weights, biases, *, final_softmax):
    """Single pallas_call over the whole MLP; grid only over the batch."""
    batch, d0 = x.shape
    n_layers = len(weights)
    d_last = weights[-1].shape[1]   # == task_dim (unpadded)

    # bf16 input stream (cast fused into this jit, no HBM round trip).
    x_bf = x.astype(jnp.bfloat16)

    # Small batch: one full-batch block (block dim == array dim is legal for
    # any size). Large batch: 1024-row blocks; a partial last block is fine
    # because out-of-bounds output rows are dropped by Pallas.
    batch_block = batch if batch <= MAX_BATCH_BLOCK else MAX_BATCH_BLOCK
    grid = (pl.cdiv(batch, batch_block),)

    in_specs = [pl.BlockSpec((batch_block, d0), lambda i: (i, 0))]
    for w, b in zip(weights, biases):
        # Constant index_map -> weights/biases stay VMEM-resident across steps.
        in_specs.append(pl.BlockSpec(w.shape, lambda i: (0, 0)))
        in_specs.append(pl.BlockSpec(b.shape, lambda i: (0, 0)))
    out_specs = pl.BlockSpec((batch_block, d_last), lambda i: (i, 0))

    # Advisory cost estimate for XLA's scheduler around the custom call.
    flops = 2 * batch * sum(w.shape[0] * w.shape[1] for w in weights)
    transcendentals = batch * d_last if final_softmax else 0
    bytes_accessed = (x_bf.size * 2 + batch * d_last * 4
                      + sum(w.size * 2 + b.size * 4
                            for w, b in zip(weights, biases)))

    # Explicit VMEM budget (safe on v5e/v6e/v7x at these widths).
    param_bytes = sum(w.size * 2 + b.size * 4 for w, b in zip(weights, biases))
    max_width = max(max(w.shape) for w in weights)
    act_bytes = batch_block * (d0 * 2 + d_last * 4 + max_width * 4 * 2)
    vmem_need = 2 * param_bytes + 2 * act_bytes
    vmem_limit = int(min(64 << 20, max(32 << 20, 2 * vmem_need)))

    kernel = functools.partial(_fused_mlp_kernel, n_layers=n_layers,
                               final_softmax=final_softmax)
    flat_params = [a for wb in zip(weights, biases) for a in wb]
    return pl.pallas_call(
        kernel,
        out_shape=jax.ShapeDtypeStruct((batch, d_last), jnp.float32),
        grid_spec=pltpu.PrefetchScalarGridSpec(
            num_scalar_prefetch=0,
            grid=grid,
            in_specs=in_specs,
            out_specs=out_specs,
        ),
        compiler_params=pltpu.CompilerParams(
            dimension_semantics=("parallel",),
            vmem_limit_bytes=vmem_limit,
        ),
        cost_estimate=pl.CostEstimate(flops=flops,
                                      transcendentals=transcendentals,
                                      bytes_accessed=bytes_accessed),
    )(x_bf, *flat_params)


# ----------------------------------------------------------------------------
# TaskDecoder in JAX (parameters built deterministically in-script)
# ----------------------------------------------------------------------------
class TaskDecoderPallas:
    def __init__(self, layers, task_embedding_size, pred_type, task_dim, key):
        self.pred_type = pred_type
        self.layers = list(layers)
        self.task_dim = task_dim

        dims = [task_embedding_size] + self.layers + [task_dim]
        n_layers = len(dims) - 1

        self.params_f32 = []   # unpadded f32 (W [in,out], b [out]) for reference
        weights_pad = []       # bf16 weights; hidden out dims padded to 128
        biases_pad = []        # f32 biases [1, out_p]

        for li in range(n_layers):
            d_in, d_out = dims[li], dims[li + 1]
            is_last = li == n_layers - 1
            key, kw, kb = jax.random.split(key, 3)
            # Deterministic init mimicking nn.Linear default (+-1/sqrt(fan_in)).
            bound = 1.0 / float(d_in) ** 0.5
            w = jax.random.uniform(kw, (d_in, d_out), jnp.float32, -bound, bound)
            b = jax.random.uniform(kb, (d_out,), jnp.float32, -bound, bound)
            self.params_f32.append((w, b))

            # First layer K and last layer N stay unpadded (full-dim blocks are
            # legal); hidden dims are zero-padded to 128 lanes.
            d_in_p = d_in if li == 0 else _round_up(d_in, LANE)
            d_out_p = d_out if is_last else _round_up(d_out, LANE)
            w_pad = jnp.zeros((d_in_p, d_out_p), jnp.float32)
            w_pad = w_pad.at[:d_in, :d_out].set(w)
            b_pad = jnp.zeros((1, d_out_p), jnp.float32)
            b_pad = b_pad.at[0, :d_out].set(b)

            weights_pad.append(w_pad.astype(jnp.bfloat16))
            biases_pad.append(b_pad)

        self.weights_pad = tuple(weights_pad)
        self.biases_pad = tuple(biases_pad)

    def __call__(self, task_embedding):
        x = jnp.asarray(task_embedding, jnp.float32)
        return _task_decoder_forward(
            x, self.weights_pad, self.biases_pad,
            final_softmax=(self.pred_type == "task_id"))


# Pure-JAX reference (matches kernel precision: bf16 MXU operands, f32 accum).
def _reference(model, x):
    h = x.astype(jnp.float32)
    n = len(model.params_f32)
    for i, (w, b) in enumerate(model.params_f32):
        y = jnp.dot(h.astype(jnp.bfloat16), w.astype(jnp.bfloat16),
                    preferred_element_type=jnp.float32) + b
        h = jax.nn.relu(y) if i < n - 1 else y
    if model.pred_type == "task_id":
        h = jax.nn.softmax(h, axis=1)
    return h


if __name__ == "__main__":
    key = jax.random.PRNGKey(0)
    key, k_param, k_x = jax.random.split(key, 3)

    # Small shapes consistent with the module's forward:
    batch = 8
    task_embedding_size = 32
    layers = [64, 32]
    task_dim = 8
    pred_type = "task_id"   # exercises the fused softmax branch

    model = TaskDecoderPallas(layers, task_embedding_size, pred_type,
                              task_dim, k_param)
    x = jax.random.normal(k_x, (batch, task_embedding_size), jnp.float32)

    y = jax.block_until_ready(model(x))
    y_ref = _reference(model, x)

    assert y.shape == (batch, task_dim)
    assert bool(jnp.allclose(y, y_ref, atol=5e-3, rtol=5e-3)), "mismatch vs reference"
    # softmax rows must sum to ~1
    assert bool(jnp.allclose(jnp.sum(y, axis=1), 1.0, atol=5e-3)), "softmax not normalized"

    print("KERNEL_OK")
</pallas_src>

<mosaic_0001>
module attributes {stable_mosaic.version = 11 : i64} {
  func.func @_fused_mlp_kernel(%arg0: i32, %arg1: memref<8x32xbf16, #tpu.memory_space<vmem>>, %arg2: memref<32x128xbf16, #tpu.memory_space<vmem>>, %arg3: memref<1x128xf32, #tpu.memory_space<vmem>>, %arg4: memref<128x128xbf16, #tpu.memory_space<vmem>>, %arg5: memref<1x128xf32, #tpu.memory_space<vmem>>, %arg6: memref<128x8xbf16, #tpu.memory_space<vmem>>, %arg7: memref<1x8xf32, #tpu.memory_space<vmem>>, %arg8: memref<8x8xf32, #tpu.memory_space<vmem>>) attributes {dimension_semantics = [#tpu.dimension_semantics<parallel>], iteration_bounds = array<i64: 1>, scalar_prefetch = 0 : i64, scratch_operands = 0 : i64, tpu.core_type = #tpu.core_type<tc>, window_params = [{transform_indices = @transform_0, window_bounds = array<i64: 8, 32>}, {pipeline_mode = #tpu.pipeline_mode<synchronous>, transform_indices = @transform_1, window_bounds = array<i64: 32, 128>}, {pipeline_mode = #tpu.pipeline_mode<synchronous>, transform_indices = @transform_2, window_bounds = array<i64: 1, 128>}, {pipeline_mode = #tpu.pipeline_mode<synchronous>, transform_indices = @transform_3, window_bounds = array<i64: 128, 128>}, {pipeline_mode = #tpu.pipeline_mode<synchronous>, transform_indices = @transform_4, window_bounds = array<i64: 1, 128>}, {pipeline_mode = #tpu.pipeline_mode<synchronous>, transform_indices = @transform_5, window_bounds = array<i64: 128, 8>}, {pipeline_mode = #tpu.pipeline_mode<synchronous>, transform_indices = @transform_6, window_bounds = array<i64: 1, 8>}, {transform_indices = @transform_7, window_bounds = array<i64: 8, 8>}]} {
    %c0 = arith.constant 0 : index
    %c0_0 = arith.constant 0 : index
    %0 = vector.load %arg1[%c0, %c0_0] : memref<8x32xbf16, #tpu.memory_space<vmem>>, vector<8x32xbf16>
    %c0_1 = arith.constant 0 : index
    %c0_2 = arith.constant 0 : index
    %1 = vector.load %arg2[%c0_1, %c0_2] : memref<32x128xbf16, #tpu.memory_space<vmem>>, vector<32x128xbf16>
    %cst = arith.constant dense<0.000000e+00> : vector<8x128xf32>
    %2 = tpu.matmul %0, %1, %cst {dimension_numbers = #tpu.dot_dimension_numbers<[1], [0], [0], [1], [0, 0, 1, 1], [], []>} : vector<8x32xbf16>, vector<32x128xbf16>, vector<8x128xf32> -> vector<8x128xf32>
    %c0_3 = arith.constant 0 : index
    %c0_4 = arith.constant 0 : index
    %3 = vector.load %arg3[%c0_3, %c0_4] : memref<1x128xf32, #tpu.memory_space<vmem>>, vector<1x128xf32>
    %4 = vector.broadcast %3 : vector<1x128xf32> to vector<8x128xf32>
    %5 = arith.addf %2, %4 : vector<8x128xf32>
    %cst_5 = arith.constant 0.000000e+00 : f32
    %6 = vector.broadcast %cst_5 : f32 to vector<8x128xf32>
    %7 = arith.maximumf %5, %6 : vector<8x128xf32>
    %8 = arith.truncf %7 : vector<8x128xf32> to vector<8x128xbf16>
    %c0_6 = arith.constant 0 : index
    %c0_7 = arith.constant 0 : index
    %9 = vector.load %arg4[%c0_6, %c0_7] : memref<128x128xbf16, #tpu.memory_space<vmem>>, vector<128x128xbf16>
    %cst_8 = arith.constant dense<0.000000e+00> : vector<8x128xf32>
    %10 = tpu.matmul %8, %9, %cst_8 {dimension_numbers = #tpu.dot_dimension_numbers<[1], [0], [0], [1], [0, 0, 1, 1], [], []>} : vector<8x128xbf16>, vector<128x128xbf16>, vector<8x128xf32> -> vector<8x128xf32>
    %c0_9 = arith.constant 0 : index
    %c0_10 = arith.constant 0 : index
    %11 = vector.load %arg5[%c0_9, %c0_10] : memref<1x128xf32, #tpu.memory_space<vmem>>, vector<1x128xf32>
    %12 = vector.broadcast %11 : vector<1x128xf32> to vector<8x128xf32>
    %13 = arith.addf %10, %12 : vector<8x128xf32>
    %cst_11 = arith.constant 0.000000e+00 : f32
    %14 = vector.broadcast %cst_11 : f32 to vector<8x128xf32>
    %15 = arith.maximumf %13, %14 : vector<8x128xf32>
    %16 = arith.truncf %15 : vector<8x128xf32> to vector<8x128xbf16>
    %c0_12 = arith.constant 0 : index
    %c0_13 = arith.constant 0 : index
    %17 = vector.load %arg6[%c0_12, %c0_13] : memref<128x8xbf16, #tpu.memory_space<vmem>>, vector<128x8xbf16>
    %cst_14 = arith.constant dense<0.000000e+00> : vector<8x8xf32>
    %18 = tpu.matmul %16, %17, %cst_14 {dimension_numbers = #tpu.dot_dimension_numbers<[1], [0], [0], [1], [0, 0, 1, 1], [], []>} : vector<8x128xbf16>, vector<128x8xbf16>, vector<8x8xf32> -> vector<8x8xf32>
    %c0_15 = arith.constant 0 : index
    %c0_16 = arith.constant 0 : index
    %19 = vector.load %arg7[%c0_15, %c0_16] : memref<1x8xf32, #tpu.memory_space<vmem>>, vector<1x8xf32>
    %20 = vector.broadcast %19 : vector<1x8xf32> to vector<8x8xf32>
    %21 = arith.addf %18, %20 : vector<8x8xf32>
    %cst_17 = arith.constant dense<0xFF800000> : vector<8xf32>
    %22 = vector.multi_reduction <maximumf>, %21, %cst_17 [1] : vector<8x8xf32> to vector<8xf32>
    %23 = vector.shape_cast %22 : vector<8xf32> to vector<8x1xf32>
    %24 = vector.broadcast %23 : vector<8x1xf32> to vector<8x8xf32>
    %25 = arith.subf %21, %24 : vector<8x8xf32>
    %26 = math.exp %25 : vector<8x8xf32>
    %cst_18 = arith.constant dense<0.000000e+00> : vector<8xf32>
    %27 = vector.multi_reduction <add>, %26, %cst_18 [1] : vector<8x8xf32> to vector<8xf32>
    %28 = vector.shape_cast %27 : vector<8xf32> to vector<8x1xf32>
    %29 = tpu.reciprocal %28 : vector<8x1xf32> -> vector<8x1xf32>
    %30 = vector.broadcast %29 : vector<8x1xf32> to vector<8x8xf32>
    %31 = arith.mulf %26, %30 : vector<8x8xf32>
    %c0_19 = arith.constant 0 : index
    %c0_20 = arith.constant 0 : index
    %32 = vector.load %arg8[%c0_19, %c0_20] : memref<8x8xf32, #tpu.memory_space<vmem>>, vector<8x8xf32>
    tpu.vector_store %arg8[%c0_19, %c0_20], %31 {strides = array<i32>} : memref<8x8xf32, #tpu.memory_space<vmem>>, vector<8x8xf32>,
    return
  }
  func.func @transform_0(%arg0: i32) -> (i32, i32) {
    %c0_i32 = arith.constant 0 : i32
    %c0_i32_0 = arith.constant 0 : i32
    return %arg0, %c0_i32 : i32, i32
  }
  func.func @transform_1(%arg0: i32) -> (i32, i32) {
    %c0_i32 = arith.constant 0 : i32
    %c0_i32_0 = arith.constant 0 : i32
    %c0_i32_1 = arith.constant 0 : i32
    return %c0_i32, %c0_i32_0 : i32, i32
  }
  func.func @transform_2(%arg0: i32) -> (i32, i32) {
    %c0_i32 = arith.constant 0 : i32
    %c0_i32_0 = arith.constant 0 : i32
    %c0_i32_1 = arith.constant 0 : i32
    return %c0_i32, %c0_i32_0 : i32, i32
  }
  func.func @transform_3(%arg0: i32) -> (i32, i32) {
    %c0_i32 = arith.constant 0 : i32
    %c0_i32_0 = arith.constant 0 : i32
    %c0_i32_1 = arith.constant 0 : i32
    return %c0_i32, %c0_i32_0 : i32, i32
  }
  func.func @transform_4(%arg0: i32) -> (i32, i32) {
    %c0_i32 = arith.constant 0 : i32
    %c0_i32_0 = arith.constant 0 : i32
    %c0_i32_1 = arith.constant 0 : i32
    return %c0_i32, %c0_i32_0 : i32, i32
  }
  func.func @transform_5(%arg0: i32) -> (i32, i32) {
    %c0_i32 = arith.constant 0 : i32
    %c0_i32_0 = arith.constant 0 : i32
    %c0_i32_1 = arith.constant 0 : i32
    return %c0_i32, %c0_i32_0 : i32, i32
  }
  func.func @transform_6(%arg0: i32) -> (i32, i32) {
    %c0_i32 = arith.constant 0 : i32
    %c0_i32_0 = arith.constant 0 : i32
    %c0_i32_1 = arith.constant 0 : i32
    return %c0_i32, %c0_i32_0 : i32, i32
  }
  func.func @transform_7(%arg0: i32) -> (i32, i32) {
    %c0_i32 = arith.constant 0 : i32
    %c0_i32_0 = arith.constant 0 : i32
    return %arg0, %c0_i32 : i32, i32
  }
}

</mosaic_0001>

<bundles_post_ra>
// kernel: _task_decoder_forward.1
= control target key start
LH: loop header
LB: loop body
LE: loop exit
PB: predicated region body
PF: predicated region fallthrough
CT: control target
= control target key end

     0   :  { %s512_s0 = inlined_call_operand.vmem [shape: bf16[8,32], index: 0, kind: input, shape index: {}]   ;;  %s513_s1 = inlined_call_operand.vmem [shape: bf16[32,128], index: 1, kind: input, shape index: {}]   ;;  %s514_s2 = inlined_call_operand.vmem [shape: f32[1,128], index: 2, kind: input, shape index: {}]   ;;  %s515_s3 = inlined_call_operand.vmem [shape: bf16[128,128], index: 3, kind: input, shape index: {}]   ;;  %s516_s4 = inlined_call_operand.vmem [shape: f32[1,128], index: 4, kind: input, shape index: {}]   ;;  %s517_s5 = inlined_call_operand.vmem [shape: bf16[128,8], index: 5, kind: input, shape index: {}]   ;;  %s518_s6 = inlined_call_operand.vmem [shape: f32[1,8], index: 6, kind: input, shape index: {}]   ;;  %s519_s7 = inlined_call_operand.hbm [shape: f32[8,8], index: 7, kind: output, shape index: {}]  }
   0x1   :  { %v348_v0 = vld [vmem:[%s513_s1 + $0x8] sm:$0xff]  ;;  %v356_v1 = vld [vmem:[%s515_s3 + $0x38] sm:$0xff]  ;;  %v347_v2 = vld [vmem:[%s513_s1] sm:$0xff] }
   0x2   :  { %59 = vmatpush.bf16.msra.mxu0 %v348_v0  ;;  %136 = vmatpush.bf16.msra.mxu1 %v356_v1  ;;  %v355_v3 = vld [vmem:[%s515_s3 + $0x30] sm:$0xff] }
   0x3   :  { %12 = vsyncpa [#allocation3], 0  ;;  %v28_v4 = vld [vmem:[%s512_s0] sm:$0xf]  ;;  %vm49_vm0 = vcmask 261120   ;;  %v354_v5 = vld [vmem:[%s515_s3 + $0x28] sm:$0xff] }
   0x4   :  { %v353_v6 = vld [vmem:[%s515_s3 + $0x20] sm:$0xff]  ;;  %v352_v7 = vld [vmem:[%s515_s3 + $0x18] sm:$0xff]  ;;  %v351_v8 = vld [vmem:[%s515_s3 + $0x10] sm:$0xff]  ;;  %vm232_vm1 = vcmask 64512   ;;  %s265_s17 = sshll.u32 %s519_s7, 4  ;;  %s266_s17 = int_to_ptr.hbm [resolvable:$true] %s265_s17 }
   0x5   :  { %v350_v9 = vld [vmem:[%s515_s3 + $0x8] sm:$0xff]  ;;  %v349_v10 = vld [vmem:[%s515_s3] sm:$0xff]  ;;  %v364_v11 = vld [vmem:[%s517_s5 + $0x38] sm:$0xff] }
   0x6   :  { %60 = vmatpush.bf16.msra.mxu0 %v347_v2  ;;  %137 = vmatpush.bf16.msra.mxu1 %v355_v3  ;;  %v363_v12 = vld [vmem:[%s517_s5 + $0x30] sm:$0xff]  ;;  %v362_v13 = vld [vmem:[%s517_s5 + $0x28] sm:$0xff]  ;;  %v361_v14 = vld [vmem:[%s517_s5 + $0x20] sm:$0xff] }
   0x7   :  { %219 = vmatpush.bf16.msra.mxu2 %v364_v11  ;;  %v360_v15 = vld [vmem:[%s517_s5 + $0x18] sm:$0xff]  ;;  %v359_v16 = vld [vmem:[%s517_s5 + $0x10] sm:$0xff]  ;;  %v366_v17 = vld [vmem:[%s514_s2] ss:$0 sm:$0xff] }
   0x8   :  { %v358_v23 = vld [vmem:[%s517_s5 + $0x8] sm:$0xff]  ;;  %v357_v24 = vld [vmem:[%s517_s5] sm:$0xff] }
   0x9   :  { %282 = vmatmul.msk.bf16.vlgmr.msra.gmra.mxu0 %vm49_vm0, %v28_v4  ;;  %v367_v25 = vld [vmem:[%s516_s4] ss:$0 sm:$0xff]  ;;  %s399_s4 = smov [#allocation2]  }
   0xa   :  { %138 = vmatpush.bf16.msra.mxu1 %v354_v5  ;;  %v368_v31 = vld [vmem:[%s518_s6] ss:$0 sm:$0xff]  ;;  %s263_s5 = sshll.u32 %s399_s4, 4  ;;  %s264_s5 = int_to_ptr.vmem [resolvable:$true] %s263_s5 }
   0xb   :  { %220 = vmatpush.bf16.msra.mxu2 %v363_v12 }
   0xe   :  { %139 = vmatpush.bf16.msra.mxu1 %v353_v6 }
   0xf   :  { %221 = vmatpush.bf16.msra.mxu2 %v362_v13 }
  0x12   :  { %140 = vmatpush.bf16.msra.mxu1 %v352_v7 }
  0x13   :  { %222 = vmatpush.bf16.msra.mxu2 %v361_v14 }
  0x16   :  { %141 = vmatpush.bf16.msra.mxu1 %v351_v8 }
  0x17   :  { %223 = vmatpush.bf16.msra.mxu2 %v360_v15 }
  0x1a   :  { %142 = vmatpush.bf16.msra.mxu1 %v350_v9 }
  0x1b   :  { %224 = vmatpush.bf16.msra.mxu2 %v359_v16 }
  0x1e   :  { %143 = vmatpush.bf16.msra.mxu1 %v349_v10 }
  0x1f   :  { %225 = vmatpush.bf16.msra.mxu2 %v358_v23 }
  0x23   :  { %226 = vmatpush.bf16.msra.mxu2 %v357_v24 }
  0x86   :  { %v62_v18 = vpop.f32.mrf.mxu0 }
  0x87   :  { %v63_v19 = vadd.f32 %v366_v17, %v62_v18 }
  0x89   :  { %v66_v20 = vmax.f32 %v63_v19, 0.0 }
  0x8b   :  { %v67_v21 = vpack.c.bf16 %v66_v20, %v66_v20 }
  0x8d   :  { %144 = vmatmul.bf16.vlgmr.msra.gmra.mxu1 %v67_v21 }
  0x8e   :  { %v64_v22 = vpop.f32.mrf.mxu0 }
 0x10a   :  { %v145_v26 = vpop.f32.mrf.mxu1 }
 0x10b   :  { %v146_v27 = vadd.f32 %v367_v25, %v145_v26 }
 0x10d   :  { %v149_v28 = vmax.f32 %v146_v27, 0.0 }
 0x10f   :  { %v150_v29 = vpack.c.bf16 %v149_v28, %v149_v28 }
 0x111   :  { %227 = vmatmul.bf16.vlgmr.msra.gmra.mxu2 %v150_v29 }
 0x112   :  { %v147_v30 = vpop.f32.mrf.mxu1 }
 0x194   :  { %v228_v32 = vpop.f32.mrf.mxu2 }
 0x195   :  { %v229_v33 = vadd.f32 %v368_v31, %v228_v32 }
 0x197   :  { %v233_v34 = vsel %vm232_vm1, %v229_v33, -inf }
 0x198   :  { %234 = vmax.xlane.f32.xlu0 %v233_v34 }
 0x19c   :  { %v230_v35 = vpop.f32.mrf.mxu2 }
 0x20b   :  { %v235_v36 = vpop.xlane.xlu0 %234 }
 0x20c   :  { %v236_v37 = vsub.f32 %v229_v33, %v235_v36 }
 0x20e   :  { %v237_v38 = vmul.f32 1.442695, %v236_v37 }
 0x210   :  { %369 = vpow2.f32 %v237_v38 }
 0x216   :  { %v370_v39 = vpop.eup %369 }
 0x217   :  { %v239_v40 = vsel %vm232_vm1, %v370_v39, 0.0 }
 0x218   :  { %240 = vadd.xlane.f32.xlu0 %v239_v40 }
 0x28b   :  { %v241_v41 = vpop.xlane.xlu0 %240 }
 0x28c   :  { %371 = vrcp.f32 %v241_v41  ;;  %v253_v45 = vand.u32 2147483648, %v241_v41  ;;  %v251_v47 = vand.u32 2147483647, %v241_v41  ;;  %vm247_vm3 = vweird.f32 %v241_v41 }
 0x28e   :  { %v254_v49 = vor.u32 1.1754944e-38, %v253_v45  ;;  %vm252_vm5 = vcmp.eq.f32.partialorder %v251_v47, 8.507059e+37 }
 0x292   :  { %v372_v42 = vpop.eup %371 }
 0x293   :  { %v243_v43 = vmul.f32 %v372_v42, %v241_v41  ;;  %vm248_vm2 = vweird.f32 %v372_v42 }
 0x294   :  { %vm249_vm4 = vmor %vm247_vm3, %vm248_vm2 }
 0x295   :  { %v244_v44 = vsub.f32 1.0, %v243_v43 }
 0x297   :  { %v245_v46 = vmul.f32 %v372_v42, %v244_v44 }
 0x299   :  { %v246_v48 = vadd.f32 %v372_v42, %v245_v46 }
 0x29b   :  { %v250_v50 = vsel %vm249_vm4, %v372_v42, %v246_v48 }
 0x29c   :  { %v255_v51 = vsel %vm252_vm5, %v254_v49, %v250_v50 }
 0x29d   :  { %v256_v52 = vmul.f32 %v370_v39, %v255_v51 }
 0x29f   :  { %257 = vst.msk [vmem:[#allocation2] sm:$0xff] %vm232_vm1, %v256_v52 }
 0x2a0   :  { %268 = dma.vmem_to_hbm [thread:$0]  %s264_s5, 128, %s266_s17, [#allocation3]  }
 0x2a1   :  { %397 = dma.done.wait [#allocation3], 128  }
 0x2a2   :  { %398 = vsyncadd [#allocation3], 4294967168 }
 0x2a3   :  { %273 = vsyncpa [#allocation3], 1 }

</bundles_post_ra>
